<compile_context>
chip_gen: v6e
topology: v6e:2x2x1
jax: 0.10.0
libtpu: 0.0.40
codegen_flags: <defaults>
</compile_context>

<pallas_src>
import functools

import jax
import jax.numpy as jnp
from jax.experimental import pallas as pl
from jax.experimental.pallas import tpu as pltpu

_SELU_ALPHA = 1.6732632423543772
_SELU_SCALE = 1.0507009873554805


# ------------------------------- Pallas kernel ------------------------------- #

def _linear_block_kernel(*refs, norm_layer, activation, eps):
    """Fused Linear(+SpectralNorm) -> (LayerNorm|BatchNorm|none) -> activation.

    Ref order (inputs, then output):
      x (tb, Din), wt (Din, Dout) == W.T, b (1, Dout),
      [u (1, Dout) if 'sn'], [gamma (1, Dout), beta (1, Dout) if 'ln'/'bn'],
      [prelu_a (1, 1) if 'prelu'], out (tb, Dout)
    """
    refs = list(refs)
    o_ref = refs.pop()                       # output is last (no scratch used)
    it = iter(refs)
    x_ref, w_ref, b_ref = next(it), next(it), next(it)
    u_ref = next(it) if norm_layer == "sn" else None
    gamma_ref = beta_ref = None
    if norm_layer in ("ln", "bn"):
        gamma_ref = next(it)
        beta_ref = next(it)
    prelu_ref = next(it) if activation == "prelu" else None

    wt = w_ref[...]                          # (Din, Dout) == W.T

    if norm_layer == "sn":
        # One power iteration (SpectralNorm.power_iterations=1), then W / sigma.
        # u is (1, Dout); W = wt.T, so W^T u == contract on wt's lane axis.
        u = u_ref[...]
        v = jax.lax.dot_general(u, wt, (((1,), (1,)), ((), ())),
                                preferred_element_type=jnp.float32)       # (1, Din)
        v = v / (jnp.sqrt(jnp.sum(v * v, keepdims=True)) + 1e-12)
        wv = jnp.dot(v, wt, preferred_element_type=jnp.float32)           # (1, Dout) == (W v)^T
        u_new = wv / (jnp.sqrt(jnp.sum(wv * wv, keepdims=True)) + 1e-12)
        sigma = jnp.sum(u_new * wv, keepdims=True)                        # (1, 1)
        wt = wt / sigma
        # TODO(synk): SpectralNorm also writes the updated u/v buffers back in
        # PyTorch (training-time state); stateless here.

    h = jnp.dot(x_ref[...], wt, preferred_element_type=jnp.float32) + b_ref[...]

    if norm_layer == "ln":
        # Custom LayerNorm: per-sample mean / unbiased std over features,
        # divide by (std + eps), then per-feature affine.  (For 2-D inputs the
        # B==1 "global" branch of the PyTorch class reduces to the same math.)
        d = h.shape[1]
        mean = jnp.mean(h, axis=1, keepdims=True)
        std = jnp.sqrt(jnp.sum((h - mean) ** 2, axis=1, keepdims=True) / (d - 1))
        h = (h - mean) / (std + eps)
        h = h * gamma_ref[...] + beta_ref[...]
    elif norm_layer == "bn":
        # BatchNorm1d, training mode: batch statistics (biased variance).
        # TODO(synk): running-stat buffer updates (stateful) are not modeled.
        mean = jnp.mean(h, axis=0, keepdims=True)
        var = jnp.mean((h - mean) ** 2, axis=0, keepdims=True)
        h = (h - mean) / jnp.sqrt(var + eps)
        h = h * gamma_ref[...] + beta_ref[...]

    if activation == "relu":
        h = jnp.maximum(h, 0.0)
    elif activation == "lrelu":
        h = jnp.where(h > 0, h, 0.2 * h)
    elif activation == "prelu":
        h = jnp.where(h > 0, h, prelu_ref[...] * h)
    elif activation == "selu":
        h = _SELU_SCALE * jnp.where(h > 0, h, _SELU_ALPHA * (jnp.exp(h) - 1.0))
    elif activation == "tanh":
        h = jnp.tanh(h)
    elif activation == "sigmoid":
        h = 1.0 / (1.0 + jnp.exp(-h))
    # 'none': passthrough

    o_ref[...] = h


# --------------------------------- wrapper ----------------------------------- #

def linear_block_forward(x, params, *, norm_layer="none", activation="relu", eps=1e-5):
    """One fused pallas_call implementing LinearBlock.forward."""
    if norm_layer == "in":
        # TODO(synk): InstanceNorm1d needs (N, C, L) input; undefined for
        # LinearBlock's 2-D output (PyTorch itself rejects it), so not lowered.
        raise NotImplementedError("norm_layer='in' is not supported")
    assert norm_layer in ("none", "sn", "ln", "bn")
    assert activation in ("relu", "lrelu", "prelu", "selu", "tanh", "sigmoid", "none")

    B, Din = x.shape
    Dout = params["wt"].shape[1]

    args = [x, params["wt"], params["b"]]
    if norm_layer == "sn":
        args.append(params["u"])
    if norm_layer in ("ln", "bn"):
        args += [params["gamma"], params["beta"]]
    if activation == "prelu":
        args.append(params["prelu_a"])

    # Row tiling only when the batch is large and the norm does not couple rows
    # (BatchNorm needs the whole batch in one block).  'parallel' lets v7x's two
    # TensorCores split the batch; harmless elsewhere.
    if norm_layer != "bn" and B > 256 and B % 256 == 0:
        tb = 256
    else:
        tb = B
    grid = (B // tb,)

    def _full_spec(shape):
        return pl.BlockSpec(shape, lambda i, _s=shape: (0,) * len(_s))

    in_specs = [pl.BlockSpec((tb, Din), lambda i: (i, 0))]
    in_specs += [_full_spec(a.shape) for a in args[1:]]
    out_specs = pl.BlockSpec((tb, Dout), lambda i: (i, 0))

    kernel = functools.partial(_linear_block_kernel, norm_layer=norm_layer,
                               activation=activation, eps=eps)
    return pl.pallas_call(
        kernel,
        out_shape=jax.ShapeDtypeStruct((B, Dout), jnp.float32),
        grid=grid,
        in_specs=in_specs,
        out_specs=out_specs,
        compiler_params=pltpu.CompilerParams(dimension_semantics=("parallel",)),
    )(*args)


# ---------------------------- pure-JAX reference ----------------------------- #

def _ref_forward(x, params, norm_layer, activation, eps=1e-5):
    hi = jax.lax.Precision.HIGHEST
    wt = params["wt"]
    if norm_layer == "sn":
        w = wt.T                                        # (Dout, Din) == nn.Linear.weight
        u = params["u"].reshape(-1)
        v = jnp.dot(w.T, u, precision=hi)
        v = v / (jnp.linalg.norm(v) + 1e-12)
        wv = jnp.dot(w, v, precision=hi)
        u2 = wv / (jnp.linalg.norm(wv) + 1e-12)
        sigma = jnp.dot(u2, wv, precision=hi)
        wt = wt / sigma
    h = jnp.dot(x, wt, precision=hi) + params["b"]
    if norm_layer == "ln":
        d = h.shape[1]
        mean = h.mean(axis=1, keepdims=True)
        std = jnp.sqrt(((h - mean) ** 2).sum(axis=1, keepdims=True) / (d - 1))
        h = (h - mean) / (std + eps)
        h = h * params["gamma"] + params["beta"]
    elif norm_layer == "bn":
        mean = h.mean(axis=0, keepdims=True)
        var = ((h - mean) ** 2).mean(axis=0, keepdims=True)
        h = (h - mean) / jnp.sqrt(var + eps)
        h = h * params["gamma"] + params["beta"]
    if activation == "relu":
        h = jnp.maximum(h, 0.0)
    elif activation == "lrelu":
        h = jnp.where(h > 0, h, 0.2 * h)
    elif activation == "prelu":
        h = jnp.where(h > 0, h, params["prelu_a"] * h)
    elif activation == "selu":
        h = _SELU_SCALE * jnp.where(h > 0, h, _SELU_ALPHA * (jnp.exp(h) - 1.0))
    elif activation == "tanh":
        h = jnp.tanh(h)
    elif activation == "sigmoid":
        h = 1.0 / (1.0 + jnp.exp(-h))
    return h


# ----------------------------------- main ------------------------------------ #

if __name__ == "__main__":
    # LinearBlock(input_dim=64, output_dim=128); Dout=128 keeps the output lane-dense.
    B, Din, Dout = 8, 64, 128
    key = jax.random.PRNGKey(0)
    ks = jax.random.split(key, 6)
    x = jax.random.normal(ks[0], (B, Din), jnp.float32)

    u0 = jax.random.normal(ks[4], (Dout,), jnp.float32)
    params = {
        "wt": 0.1 * jax.random.normal(ks[1], (Din, Dout), jnp.float32),  # == weight.T
        "b": 0.05 * jax.random.normal(ks[2], (1, Dout), jnp.float32),
        "gamma": jax.random.uniform(ks[3], (1, Dout), jnp.float32),      # LayerNorm gamma init
        "beta": jnp.zeros((1, Dout), jnp.float32),
        "u": (u0 / (jnp.linalg.norm(u0) + 1e-12)).reshape(1, Dout),      # SpectralNorm u
        "prelu_a": jnp.full((1, 1), 0.25, jnp.float32),                  # PReLU init
    }

    configs = [
        ("none", "relu"),        # LinearBlock defaults
        ("ln", "lrelu"),
        ("sn", "tanh"),
        ("bn", "sigmoid"),
        ("none", "prelu"),
        ("none", "selu"),
        ("none", "none"),
    ]
    for nl, act in configs:
        out = linear_block_forward(x, params, norm_layer=nl, activation=act)
        jax.block_until_ready(out)
        ref = _ref_forward(x, params, nl, act)
        assert out.shape == (B, Dout)
        assert jnp.allclose(out, ref, atol=2e-3, rtol=2e-3), f"mismatch for {nl}/{act}"

    # Larger batch exercises the row-tiled 'parallel' grid path.
    xb = jax.random.normal(ks[5], (512, Din), jnp.float32)
    outb = linear_block_forward(xb, params, norm_layer="none", activation="relu")
    jax.block_until_ready(outb)
    refb = _ref_forward(xb, params, "none", "relu")
    assert jnp.allclose(outb, refb, atol=2e-3, rtol=2e-3), "tiled-path mismatch"

    print("KERNEL_OK")
</pallas_src>

<mosaic_0001>
module attributes {stable_mosaic.version = 11 : i64} {
  func.func @_linear_block_kernel(%arg0: i32, %arg1: memref<8x64xf32, #tpu.memory_space<vmem>>, %arg2: memref<64x128xf32, #tpu.memory_space<vmem>>, %arg3: memref<1x128xf32, #tpu.memory_space<vmem>>, %arg4: memref<8x128xf32, #tpu.memory_space<vmem>>) attributes {dimension_semantics = [#tpu.dimension_semantics<parallel>], iteration_bounds = array<i64: 1>, scalar_prefetch = 0 : i64, scratch_operands = 0 : i64, tpu.core_type = #tpu.core_type<tc>, window_params = [{transform_indices = @transform_0, window_bounds = array<i64: 8, 64>}, {pipeline_mode = #tpu.pipeline_mode<synchronous>, transform_indices = @transform_1, window_bounds = array<i64: 64, 128>}, {pipeline_mode = #tpu.pipeline_mode<synchronous>, transform_indices = @transform_2, window_bounds = array<i64: 1, 128>}, {transform_indices = @transform_3, window_bounds = array<i64: 8, 128>}]} {
    %c0 = arith.constant 0 : index
    %c0_0 = arith.constant 0 : index
    %0 = vector.load %arg2[%c0, %c0_0] : memref<64x128xf32, #tpu.memory_space<vmem>>, vector<64x128xf32>
    %c0_1 = arith.constant 0 : index
    %c0_2 = arith.constant 0 : index
    %1 = vector.load %arg1[%c0_1, %c0_2] : memref<8x64xf32, #tpu.memory_space<vmem>>, vector<8x64xf32>
    %cst = arith.constant dense<0.000000e+00> : vector<8x128xf32>
    %2 = tpu.matmul %1, %0, %cst {dimension_numbers = #tpu.dot_dimension_numbers<[1], [0], [0], [1], [0, 0, 1, 1], [], []>} : vector<8x64xf32>, vector<64x128xf32>, vector<8x128xf32> -> vector<8x128xf32>
    %c0_3 = arith.constant 0 : index
    %c0_4 = arith.constant 0 : index
    %3 = vector.load %arg3[%c0_3, %c0_4] : memref<1x128xf32, #tpu.memory_space<vmem>>, vector<1x128xf32>
    %4 = vector.broadcast %3 : vector<1x128xf32> to vector<8x128xf32>
    %5 = arith.addf %2, %4 : vector<8x128xf32>
    %cst_5 = arith.constant 0.000000e+00 : f32
    %6 = vector.broadcast %cst_5 : f32 to vector<8x128xf32>
    %7 = arith.maximumf %5, %6 : vector<8x128xf32>
    %c0_6 = arith.constant 0 : index
    %c0_7 = arith.constant 0 : index
    %8 = vector.load %arg4[%c0_6, %c0_7] : memref<8x128xf32, #tpu.memory_space<vmem>>, vector<8x128xf32>
    tpu.vector_store %arg4[%c0_6, %c0_7], %7 {strides = array<i32>} : memref<8x128xf32, #tpu.memory_space<vmem>>, vector<8x128xf32>,
    return
  }
  func.func @transform_0(%arg0: i32) -> (i32, i32) {
    %c0_i32 = arith.constant 0 : i32
    %c0_i32_0 = arith.constant 0 : i32
    return %arg0, %c0_i32 : i32, i32
  }
  func.func @transform_1(%arg0: i32) -> (i32, i32) {
    %c0_i32 = arith.constant 0 : i32
    %c0_i32_0 = arith.constant 0 : i32
    %c0_i32_1 = arith.constant 0 : i32
    return %c0_i32, %c0_i32_0 : i32, i32
  }
  func.func @transform_2(%arg0: i32) -> (i32, i32) {
    %c0_i32 = arith.constant 0 : i32
    %c0_i32_0 = arith.constant 0 : i32
    %c0_i32_1 = arith.constant 0 : i32
    return %c0_i32, %c0_i32_0 : i32, i32
  }
  func.func @transform_3(%arg0: i32) -> (i32, i32) {
    %c0_i32 = arith.constant 0 : i32
    %c0_i32_0 = arith.constant 0 : i32
    return %arg0, %c0_i32 : i32, i32
  }
}

</mosaic_0001>

<bundles_post_ra>
// kernel: tpu_custom_call.1
= control target key start
LH: loop header
LB: loop body
LE: loop exit
PB: predicated region body
PF: predicated region fallthrough
CT: control target
= control target key end

     0   :  { %8 = vsyncpa [#allocation3], 0  ;;  %s291_s0 = inlined_call_operand.hbm [shape: f32[8,64], index: 0, kind: input, shape index: {}]   ;;  %s292_s1 = inlined_call_operand.hbm [shape: f32[64,128], index: 1, kind: input, shape index: {}]   ;;  %s293_s2 = inlined_call_operand.vmem [shape: f32[1,128], index: 2, kind: input, shape index: {}]   ;;  %s294_s3 = inlined_call_operand.hbm [shape: f32[8,128], index: 3, kind: output, shape index: {}]  }
   0x1   :  { %9 = vsyncpa [#allocation6], 0 }
   0x2   :  { %10 = vsyncpa [#allocation4], 0  ;;  %s252_s12 = smov [#allocation2]   ;;  %s253_s14 = smov [#allocation5]  }
   0x3   :  { %s17_s13 = sshll.u32 %s252_s12, 4  ;;  %s26_s15 = sshll.u32 %s253_s14, 4  ;;  %s18_s13 = int_to_ptr.vmem [resolvable:$true] %s17_s13  ;;  %s27_s15 = int_to_ptr.vmem [resolvable:$true] %s26_s15 }
   0x4   :  { %s194_s16 = scalar_lea.vmem %s18_s13, 128  ;;  %p199_p1 = scmp.lt.s32.totalorder %s18_s13, %s18_s13 }
   0x5   :  { %p195_p0 = scmp.ne.s32.totalorder %s18_s13, %s194_s16  ;;  %p200_p2 = scmp.lt.s32.totalorder %s194_s16, %s194_s16 }
   0x7   :  { %p201_p3 = por %p200_p2, %p199_p1 }
   0x9   :  { %p202_p4 = pnand %p201_p3, %p195_p0 }
   0xb   :  { %205 = shalt.err (!%p202_p4)
}
   0xc   :  { %20 = dma.hbm_to_vmem [thread:$0]  %s291_s0, 128, %s18_s13, [#allocation3]  }
   0xd   :  { %s214_s19 = scalar_lea.vmem %s27_s15, 1024  ;;  %p219_p6 = scmp.lt.s32.totalorder %s27_s15, %s27_s15 }
   0xe   :  { %p215_p5 = scmp.ne.s32.totalorder %s27_s15, %s214_s19  ;;  %p220_p7 = scmp.lt.s32.totalorder %s214_s19, %s214_s19 }
  0x10   :  { %p221_p8 = por %p220_p7, %p219_p6 }
  0x12   :  { %p222_p9 = pnand %p221_p8, %p215_p5 }
  0x14   :  { %225 = shalt.err (!%p222_p9)
}
  0x15   :  { %s254_s20 = smov 128   ;;  %s255_s21 = smov 8  }
  0x16   :  { %32 = dma.hbm_to_vmem [thread:$0]  %s292_s1, 1024, %s27_s15, [#allocation6], %s254_s20, %s254_s20, %s255_s21  }
  0x17   :  { %246 = dma.done.wait [#allocation3], 128  }
  0x18   :  { %247 = vsyncadd [#allocation3], 4294967168 }
  0x19   :  { %248 = dma.done.wait [#allocation6], 1024  }
  0x1a   :  { %249 = vsyncadd [#allocation6], 4294966272  ;;  %v256_v0 = vmov 0.0   ;;  %vm257_vm0 = vmmov 0   ;;  %v48_v1 = vld [vmem:[#allocation5 + $0x38] sm:$0xff]  ;;  %v47_v2 = vld [vmem:[#allocation5 + $0x30] sm:$0xff] }
  0x1b   :  { %160 = vmatprep.subr.mxu0 %v256_v0  ;;  %176 = vmatprep.mubr.msk.f32.mxu0 %vm257_vm0, %v256_v0  ;;  %v46_v3 = vld [vmem:[#allocation5 + $0x28] sm:$0xff]  ;;  %v45_v4 = vld [vmem:[#allocation5 + $0x20] sm:$0xff]  ;;  %v44_v5 = vld [vmem:[#allocation5 + $0x18] sm:$0xff]  ;;  %vm57_vm1 = vcmask 523264   ;;  %s258_s24 = smov [#allocation7]  }
  0x1c   :  { %161 = vmatpush3.msra.mxu0 %v48_v1  ;;  %v43_v6 = vld [vmem:[#allocation5 + $0x10] sm:$0xff]  ;;  %v42_v7 = vld [vmem:[#allocation5 + $0x8] sm:$0xff]  ;;  %v41_v8 = vld [vmem:[#allocation5] sm:$0xff]  ;;  %s139_s25 = sshll.u32 %s258_s24, 4  ;;  %s140_s25 = int_to_ptr.vmem [resolvable:$true] %s139_s25 }
  0x1d   :  { %162 = vmatprep.subr.mxu0 %v256_v0  ;;  %v49_v9 = vld [vmem:[#allocation2] sm:$0xff]  ;;  %s226_s26 = scalar_lea.vmem %s140_s25, 128  ;;  %p231_p11 = scmp.lt.s32.totalorder %s140_s25, %s140_s25 }
  0x1e   :  { %163 = vmatpush3.msra.mxu0 %v47_v2  ;;  %v149_v10 = vld [vmem:[%s293_s2] ss:$0 sm:$0xff]  ;;  %p227_p10 = scmp.ne.s32.totalorder %s140_s25, %s226_s26  ;;  %p232_p12 = scmp.lt.s32.totalorder %s226_s26, %s226_s26 }
  0x1f   :  { %164 = vmatprep.subr.mxu0 %v256_v0 }
  0x20   :  { %165 = vmatpush3.msra.mxu0 %v46_v3  ;;  %p233_p13 = por %p232_p12, %p231_p11 }
  0x21   :  { %166 = vmatprep.subr.mxu0 %v256_v0 }
  0x22   :  { %167 = vmatpush3.msra.mxu0 %v45_v4  ;;  %p234_p0 = pnand %p233_p13, %p227_p10 }
  0x23   :  { %168 = vmatprep.subr.mxu0 %v256_v0 }
  0x24   :  { %169 = vmatpush3.msra.mxu0 %v44_v5 }
  0x25   :  { %170 = vmatprep.subr.mxu0 %v256_v0 }
  0x26   :  { %171 = vmatpush3.msra.mxu0 %v43_v6 }
  0x27   :  { %172 = vmatprep.subr.mxu0 %v256_v0 }
  0x28   :  { %173 = vmatpush3.msra.mxu0 %v42_v7 }
  0x29   :  { %174 = vmatprep.subr.mxu0 %v256_v0 }
  0x2a   :  { %175 = vmatpush3.msra.mxu0 %v41_v8 }
  0x2b   :  { %177 = vmatmul.mubr.msk.f32.vlgmr.msra.gmra.mxu0 %vm57_vm1, %v49_v9 }
  0xeb   :  { %v127_v11 = vpop.f32.mrf.mxu0 }
  0xec   :  { %v128_v12 = vadd.f32 %v149_v10, %v127_v11 }
  0xed   :  { %v178_v13 = vpop.f32.mrf.mxu0 }
  0xee   :  { %v131_v14 = vmax.f32 %v128_v12, 0.0 }
  0xf0   :  { %132 = vst [vmem:[#allocation7] sm:$0xff] %v131_v14 }
  0xf1   :  { %237 = shalt.err (!%p234_p0)
}
  0xf2   :  { %142 = dma.vmem_to_hbm [thread:$0]  %s140_s25, 128, %s294_s3, [#allocation4]  }
  0xf3   :  { %250 = dma.done.wait [#allocation4], 128  }
  0xf4   :  { %251 = vsyncadd [#allocation4], 4294967168 }
  0xf5   :  { %146 = vsyncpa [#allocation3], 1 }
  0xf6   :  { %147 = vsyncpa [#allocation6], 1 }
  0xf7   :  { %148 = vsyncpa [#allocation4], 1 }

</bundles_post_ra>
